<compile_context>
chip_gen: v5e
topology: v5e:2x2
jax: 0.10.0
libtpu: 0.0.40
codegen_flags: <defaults>
</compile_context>

<pallas_src>
import functools

import jax
import jax.numpy as jnp
from jax.experimental import pallas as pl
from jax.experimental.pallas import tpu as pltpu


def _round_up(x, m):
    return ((x + m - 1) // m) * m


def _choose_block(batch_size):
    """Largest convenient tile that keeps the (8,128) layout rules satisfied."""
    for cand in (512, 256, 128):
        if batch_size >= cand:
            return cand
    return _round_up(max(batch_size, 1), 8)


def _subcl_kernel(a_ref, b_ref, m_ref, sel_ref, mdiag_ref, out_ref,
                  pos_acc, den_acc, *, inv_temp, blk, b_real, nb_b):
    # a_ref    : [blk, H]   anchor rows of the contrast features (bf16/f32)
    # b_ref    : [blk, H]   contrast rows (same array, column tile)
    # m_ref    : [blk, blk] block of the (padded) [Bp, Bp] positive mask
    # sel_ref  : [blk, 1]   anchor-row selection (mask_sents, per Bp period)
    # mdiag_ref: [blk, 1]   diagonal of the (padded) mask, per Bp period
    # out_ref  : [1, 8, 128] per-row-tile partial sum of sel * log_term
    # pos_acc / den_acc: [blk, 1] f32 scratch accumulators
    i = pl.program_id(0)          # anchor (row) tile  -- "parallel"
    j = pl.program_id(1)          # contrast (col) tile -- "arbitrary" reduction

    @pl.when(j == 0)
    def _init():
        pos_acc[...] = jnp.zeros_like(pos_acc)
        den_acc[...] = jnp.zeros_like(den_acc)

    a = a_ref[...]
    b = b_ref[...]

    # Gram tile on the MXU: contract the hidden dim of BOTH operands, so no
    # explicit transpose of the contrast tile is materialized. f32 accumulate.
    s = jax.lax.dot_general(a, b, (((1,), (1,)), ((), ())),
                            preferred_element_type=jnp.float32)
    # TODO(synk): no log-sum-exp guard before exp -- matches the PyTorch
    # reference, but sim_type='dot' with unnormalized features can overflow.
    sim = jnp.exp(s * inv_temp)                          # [blk, blk] f32

    m = m_ref[...].astype(jnp.float32)                   # [blk, blk]

    row_pos = jnp.sum(sim * m, axis=1, keepdims=True)    # [blk, 1]
    row_den = jnp.sum(sim, axis=1, keepdims=True)        # [blk, 1]

    # Zero-padded contrast columns each contribute exp(0) = 1 to the plain row
    # sum; subtract that analytically (scalar math only, no column mask).
    start = (j % nb_b) * blk
    n_pad_cols = jnp.clip(start + blk - b_real, 0, blk).astype(jnp.float32)
    row_den = row_den - n_pad_cols

    # The true diagonal of the full similarity matrix only lives on i == j
    # tiles, where diag(sim)[r] = exp(||a_r||^2 / T).
    a32 = a.astype(jnp.float32)
    diag_sim = jnp.exp(jnp.sum(a32 * a32, axis=1, keepdims=True) * inv_temp)
    is_diag = i == j
    row_den = row_den - jnp.where(is_diag, diag_sim, 0.0)
    row_pos = row_pos - jnp.where(
        is_diag, diag_sim * mdiag_ref[...].astype(jnp.float32), 0.0)

    pos_acc[...] += row_pos
    den_acc[...] += row_den

    @pl.when(j == pl.num_programs(1) - 1)
    def _finalize():
        pos = pos_acc[...]
        den = den_acc[...]                     # == pos + neg of the reference
        log_term = jnp.log((pos + 1e-8) / (den + 1e-8))
        sel = sel_ref[...].astype(jnp.float32)
        # where() (not multiply) so padded / unselected rows can never inject NaN.
        contrib = jnp.where(sel > 0.0, log_term, 0.0)
        tile_sum = jnp.sum(contrib)
        out_ref[...] = jnp.full(out_ref.shape, tile_sum, dtype=out_ref.dtype)


def subcl_loss(features, mask, mask_sents=None, *, temperature=0.07,
               sim_type="cos", use_only_sents_in_ac=True,
               base_temperature=0.07, matmul_dtype=jnp.bfloat16):
    """features: [B, 2, H]; mask: [B, B]; mask_sents: [B] (or [B,1]) bool."""
    del base_temperature  # stored but unused by the reference forward
    B, C, H = features.shape

    feats = features.astype(jnp.float32)
    if sim_type == "cos":
        nrm = jnp.sqrt(jnp.sum(feats * feats, axis=-1, keepdims=True))
        feats = feats / jnp.maximum(nrm, 1e-12)

    blk = _choose_block(B)
    Bp = _round_up(B, blk)          # padded batch, tiles align with view halves
    nb_b = Bp // blk                # mask blocks per Bp period
    pad = Bp - B

    # Contrast layout: rows [0, Bp) = view 0 (zero padded), [Bp, 2Bp) = view 1.
    views = []
    for c in range(C):
        v = feats[:, c, :]
        if pad:
            v = jnp.pad(v, ((0, pad), (0, 0)))
        views.append(v)
    feat2d = jnp.concatenate(views, axis=0).astype(matmul_dtype)  # [C*Bp, H]
    Np = C * Bp

    mask_f = mask.astype(jnp.float32)
    if pad:
        mask_f = jnp.pad(mask_f, ((0, pad), (0, pad)))            # [Bp, Bp]
    mdiag = jnp.diagonal(mask_f).reshape(Bp, 1)                   # [Bp, 1]

    if use_only_sents_in_ac:
        sel_vec = mask_sents.reshape(-1).astype(jnp.float32)      # [B]
    else:
        sel_vec = jnp.ones((B,), jnp.float32)
    if pad:
        sel_vec = jnp.pad(sel_vec, (0, pad))
    sel_col = sel_vec.reshape(Bp, 1)                              # [Bp, 1]

    count = C * jnp.sum(sel_vec)          # number of selected anchor rows

    n_tiles = Np // blk
    kernel = functools.partial(_subcl_kernel, inv_temp=1.0 / temperature,
                               blk=blk, b_real=B, nb_b=nb_b)

    grid_spec = pltpu.PrefetchScalarGridSpec(
        num_scalar_prefetch=0,
        grid=(n_tiles, n_tiles),
        in_specs=[
            pl.BlockSpec((blk, H), lambda i, j: (i, 0)),                  # anchor rows
            pl.BlockSpec((blk, H), lambda i, j: (j, 0)),                  # contrast rows
            pl.BlockSpec((blk, blk), lambda i, j: (i % nb_b, j % nb_b)),  # [Bp,Bp] mask reused
            pl.BlockSpec((blk, 1), lambda i, j: (i % nb_b, 0)),           # anchor selection
            pl.BlockSpec((blk, 1), lambda i, j: (i % nb_b, 0)),           # diag(mask) per row
        ],
        out_specs=pl.BlockSpec((1, 8, 128), lambda i, j: (i, 0, 0)),
        scratch_shapes=[pltpu.VMEM((blk, 1), jnp.float32),
                        pltpu.VMEM((blk, 1), jnp.float32)],
    )

    partials = pl.pallas_call(
        kernel,
        out_shape=jax.ShapeDtypeStruct((n_tiles, 8, 128), jnp.float32),
        grid_spec=grid_spec,
        compiler_params=pltpu.CompilerParams(
            dimension_semantics=("parallel", "arbitrary"),
            vmem_limit_bytes=48 * 1024 * 1024),
    )(feat2d, feat2d, mask_f, sel_col, mdiag)

    numer = jnp.sum(partials[:, 0, 0])
    loss = -numer / count
    # Reference replaces inf/nan loss (e.g. count == 0) with 0.
    loss = jnp.where(jnp.isnan(loss) | jnp.isinf(loss), 0.0, loss)
    return loss


if __name__ == "__main__":
    key = jax.random.PRNGKey(0)
    k1, k2, k3 = jax.random.split(key, 3)

    B, H = 8, 32
    features = jax.random.normal(k1, (B, 2, H), dtype=jnp.float32)

    # Positive-pair mask [B, B]: symmetric 0/1 with self-pairs set to 1.
    m = jax.random.bernoulli(k2, p=0.3, shape=(B, B))
    mask = jnp.logical_or(m, m.T)
    mask = jnp.logical_or(mask, jnp.eye(B, dtype=bool)).astype(jnp.float32)

    # mask_sents: boolean anchor selection, ensure at least one True.
    mask_sents = jax.random.bernoulli(k3, p=0.6, shape=(B,))
    mask_sents = mask_sents.at[0].set(True)

    loss = subcl_loss(features, mask, mask_sents,
                      temperature=0.07, sim_type="cos",
                      use_only_sents_in_ac=True)
    jax.block_until_ready(loss)
    print("KERNEL_OK")
</pallas_src>

<mosaic_0001>
module attributes {stable_mosaic.version = 11 : i64} {
  func.func @_subcl_kernel(%arg0: i32, %arg1: i32, %arg2: memref<8x32xbf16, #tpu.memory_space<vmem>>, %arg3: memref<8x32xbf16, #tpu.memory_space<vmem>>, %arg4: memref<8x8xf32, #tpu.memory_space<vmem>>, %arg5: memref<8x1xf32, #tpu.memory_space<vmem>>, %arg6: memref<8x1xf32, #tpu.memory_space<vmem>>, %arg7: memref<1x8x128xf32, #tpu.memory_space<vmem>>, %arg8: memref<8x1xf32, #tpu.memory_space<vmem>>, %arg9: memref<8x1xf32, #tpu.memory_space<vmem>>) attributes {dimension_semantics = [#tpu.dimension_semantics<parallel>, #tpu.dimension_semantics<arbitrary>], iteration_bounds = array<i64: 2, 2>, scalar_prefetch = 0 : i64, scratch_operands = 2 : i64, tpu.core_type = #tpu.core_type<tc>, window_params = [{transform_indices = @transform_0, window_bounds = array<i64: 8, 32>}, {transform_indices = @transform_1, window_bounds = array<i64: 8, 32>}, {transform_indices = @transform_2, window_bounds = array<i64: 8, 8>}, {transform_indices = @transform_3, window_bounds = array<i64: 8, 1>}, {transform_indices = @transform_4, window_bounds = array<i64: 8, 1>}, {transform_indices = @transform_5, window_bounds = array<i64: 1, 8, 128>}]} {
    %c0_i32 = arith.constant 0 : i32
    %0 = arith.cmpi eq, %arg1, %c0_i32 : i32
    %1 = arith.extui %0 : i1 to i32
    %c0_i32_0 = arith.constant 0 : i32
    %2 = arith.cmpi ne, %1, %c0_i32_0 : i32
    scf.if %2 {
      %cst_34 = arith.constant 0.000000e+00 : f32
      %58 = vector.broadcast %cst_34 : f32 to vector<8x1xf32>
      %c0_35 = arith.constant 0 : index
      %c0_36 = arith.constant 0 : index
      %59 = vector.load %arg8[%c0_35, %c0_36] : memref<8x1xf32, #tpu.memory_space<vmem>>, vector<8x1xf32>
      tpu.vector_store %arg8[%c0_35, %c0_36], %58 {strides = array<i32>} : memref<8x1xf32, #tpu.memory_space<vmem>>, vector<8x1xf32>,
      %cst_37 = arith.constant 0.000000e+00 : f32
      %60 = vector.broadcast %cst_37 : f32 to vector<8x1xf32>
      %c0_38 = arith.constant 0 : index
      %c0_39 = arith.constant 0 : index
      %61 = vector.load %arg9[%c0_38, %c0_39] : memref<8x1xf32, #tpu.memory_space<vmem>>, vector<8x1xf32>
      tpu.vector_store %arg9[%c0_38, %c0_39], %60 {strides = array<i32>} : memref<8x1xf32, #tpu.memory_space<vmem>>, vector<8x1xf32>,
    } else {
    }
    %c0 = arith.constant 0 : index
    %c0_1 = arith.constant 0 : index
    %3 = vector.load %arg2[%c0, %c0_1] : memref<8x32xbf16, #tpu.memory_space<vmem>>, vector<8x32xbf16>
    %c0_2 = arith.constant 0 : index
    %c0_3 = arith.constant 0 : index
    %4 = vector.load %arg3[%c0_2, %c0_3] : memref<8x32xbf16, #tpu.memory_space<vmem>>, vector<8x32xbf16>
    %cst = arith.constant dense<0.000000e+00> : vector<8x8xf32>
    %5 = tpu.matmul %3, %4, %cst {dimension_numbers = #tpu.dot_dimension_numbers<[1], [1], [0], [0], [0, 0, 1, 0], [], []>} : vector<8x32xbf16>, vector<8x32xbf16>, vector<8x8xf32> -> vector<8x8xf32>
    %cst_4 = arith.constant 14.2857141 : f32
    %6 = vector.broadcast %cst_4 : f32 to vector<8x8xf32>
    %7 = arith.mulf %5, %6 : vector<8x8xf32>
    %8 = math.exp %7 : vector<8x8xf32>
    %c0_5 = arith.constant 0 : index
    %c0_6 = arith.constant 0 : index
    %9 = vector.load %arg4[%c0_5, %c0_6] : memref<8x8xf32, #tpu.memory_space<vmem>>, vector<8x8xf32>
    %10 = arith.mulf %8, %9 : vector<8x8xf32>
    %cst_7 = arith.constant dense<0.000000e+00> : vector<8xf32>
    %11 = vector.multi_reduction <add>, %10, %cst_7 [1] : vector<8x8xf32> to vector<8xf32>
    %12 = vector.shape_cast %11 : vector<8xf32> to vector<8x1xf32>
    %cst_8 = arith.constant dense<0.000000e+00> : vector<8xf32>
    %13 = vector.multi_reduction <add>, %8, %cst_8 [1] : vector<8x8xf32> to vector<8xf32>
    %14 = vector.shape_cast %13 : vector<8xf32> to vector<8x1xf32>
    %c1_i32 = arith.constant 1 : i32
    %c0_i32_9 = arith.constant 0 : i32
    %15 = arith.cmpi eq, %c1_i32, %c0_i32_9 : i32
    %c1_i32_10 = arith.constant 1 : i32
    %16 = arith.select %15, %c1_i32_10, %c1_i32 : i32
    %17 = arith.remsi %arg1, %16 : i32
    %c0_i32_11 = arith.constant 0 : i32
    %18 = arith.cmpi ne, %17, %c0_i32_11 : i32
    %c0_i32_12 = arith.constant 0 : i32
    %19 = arith.cmpi slt, %17, %c0_i32_12 : i32
    %c0_i32_13 = arith.constant 0 : i32
    %20 = arith.cmpi slt, %16, %c0_i32_13 : i32
    %21 = arith.xori %19, %20 : i1
    %22 = arith.andi %21, %18 : i1
    %23 = arith.addi %17, %16 : i32
    %24 = arith.select %22, %23, %17 : i32
    %c8_i32 = arith.constant 8 : i32
    %25 = arith.muli %24, %c8_i32 : i32
    %c8_i32_14 = arith.constant 8 : i32
    %26 = arith.addi %25, %c8_i32_14 : i32
    %c8_i32_15 = arith.constant 8 : i32
    %27 = arith.subi %26, %c8_i32_15 : i32
    %c0_i32_16 = arith.constant 0 : i32
    %c8_i32_17 = arith.constant 8 : i32
    %28 = arith.maxsi %c0_i32_16, %27 : i32
    %29 = arith.minsi %c8_i32_17, %28 : i32
    %30 = arith.sitofp %29 : i32 to f32
    %31 = vector.broadcast %30 : f32 to vector<8x1xf32>
    %32 = arith.subf %14, %31 : vector<8x1xf32>
    %33 = arith.extf %3 : vector<8x32xbf16> to vector<8x32xf32>
    %34 = arith.mulf %33, %33 : vector<8x32xf32>
    %cst_18 = arith.constant dense<0.000000e+00> : vector<8xf32>
    %35 = vector.multi_reduction <add>, %34, %cst_18 [1] : vector<8x32xf32> to vector<8xf32>
    %36 = vector.shape_cast %35 : vector<8xf32> to vector<8x1xf32>
    %cst_19 = arith.constant 14.2857141 : f32
    %37 = vector.broadcast %cst_19 : f32 to vector<8x1xf32>
    %38 = arith.mulf %36, %37 : vector<8x1xf32>
    %39 = math.exp %38 : vector<8x1xf32>
    %40 = arith.cmpi eq, %arg0, %arg1 : i32
    %cst_20 = arith.constant 0.000000e+00 : f32
    %41 = vector.broadcast %cst_20 : f32 to vector<8x1xf32>
    %42 = arith.select %40, %39, %41 : vector<8x1xf32>
    %43 = arith.subf %32, %42 : vector<8x1xf32>
    %c0_21 = arith.constant 0 : index
    %c0_22 = arith.constant 0 : index
    %44 = vector.load %arg6[%c0_21, %c0_22] : memref<8x1xf32, #tpu.memory_space<vmem>>, vector<8x1xf32>
    %45 = arith.mulf %39, %44 : vector<8x1xf32>
    %cst_23 = arith.constant 0.000000e+00 : f32
    %46 = vector.broadcast %cst_23 : f32 to vector<8x1xf32>
    %47 = arith.select %40, %45, %46 : vector<8x1xf32>
    %48 = arith.subf %12, %47 : vector<8x1xf32>
    %c0_24 = arith.constant 0 : index
    %c0_25 = arith.constant 0 : index
    %49 = vector.load %arg8[%c0_24, %c0_25] : memref<8x1xf32, #tpu.memory_space<vmem>>, vector<8x1xf32>
    %50 = arith.addf %49, %48 : vector<8x1xf32>
    %c0_26 = arith.constant 0 : index
    %c0_27 = arith.constant 0 : index
    %51 = vector.load %arg8[%c0_26, %c0_27] : memref<8x1xf32, #tpu.memory_space<vmem>>, vector<8x1xf32>
    tpu.vector_store %arg8[%c0_26, %c0_27], %50 {strides = array<i32>} : memref<8x1xf32, #tpu.memory_space<vmem>>, vector<8x1xf32>,
    %c0_28 = arith.constant 0 : index
    %c0_29 = arith.constant 0 : index
    %52 = vector.load %arg9[%c0_28, %c0_29] : memref<8x1xf32, #tpu.memory_space<vmem>>, vector<8x1xf32>
    %53 = arith.addf %52, %43 : vector<8x1xf32>
    %c0_30 = arith.constant 0 : index
    %c0_31 = arith.constant 0 : index
    %54 = vector.load %arg9[%c0_30, %c0_31] : memref<8x1xf32, #tpu.memory_space<vmem>>, vector<8x1xf32>
    tpu.vector_store %arg9[%c0_30, %c0_31], %53 {strides = array<i32>} : memref<8x1xf32, #tpu.memory_space<vmem>>, vector<8x1xf32>,
    %c1_i32_32 = arith.constant 1 : i32
    %55 = arith.cmpi eq, %arg1, %c1_i32_32 : i32
    %56 = arith.extui %55 : i1 to i32
    %c0_i32_33 = arith.constant 0 : i32
    %57 = arith.cmpi ne, %56, %c0_i32_33 : i32
    scf.if %57 {
      %c0_34 = arith.constant 0 : index
      %c0_35 = arith.constant 0 : index
      %58 = vector.load %arg8[%c0_34, %c0_35] : memref<8x1xf32, #tpu.memory_space<vmem>>, vector<8x1xf32>
      %c0_36 = arith.constant 0 : index
      %c0_37 = arith.constant 0 : index
      %59 = vector.load %arg9[%c0_36, %c0_37] : memref<8x1xf32, #tpu.memory_space<vmem>>, vector<8x1xf32>
      %cst_38 = arith.constant 9.99999993E-9 : f32
      %60 = vector.broadcast %cst_38 : f32 to vector<8x1xf32>
      %61 = arith.addf %58, %60 : vector<8x1xf32>
      %cst_39 = arith.constant 9.99999993E-9 : f32
      %62 = vector.broadcast %cst_39 : f32 to vector<8x1xf32>
      %63 = arith.addf %59, %62 : vector<8x1xf32>
      %64 = arith.divf %61, %63 : vector<8x1xf32>
      %65 = math.log %64 : vector<8x1xf32>
      %c0_40 = arith.constant 0 : index
      %c0_41 = arith.constant 0 : index
      %66 = vector.load %arg5[%c0_40, %c0_41] : memref<8x1xf32, #tpu.memory_space<vmem>>, vector<8x1xf32>
      %cst_42 = arith.constant 0.000000e+00 : f32
      %67 = vector.broadcast %cst_42 : f32 to vector<8x1xf32>
      %68 = arith.cmpf ogt, %66, %67 : vector<8x1xf32>
      %cst_43 = arith.constant 0.000000e+00 : f32
      %69 = vector.broadcast %cst_43 : f32 to vector<8x1xf32>
      %70 = arith.select %68, %65, %69 : vector<8x1xi1>, vector<8x1xf32>
      %71 = vector.shape_cast %70 : vector<8x1xf32> to vector<1x8x1xf32>
      %cst_44 = arith.constant dense<0.000000e+00> : vector<1xf32>
      %72 = vector.multi_reduction <add>, %71, %cst_44 [1, 2] : vector<1x8x1xf32> to vector<1xf32>
      %73 = vector.shape_cast %72 : vector<1xf32> to vector<1x1x1xf32>
      %74 = vector.extract %73[0, 0, 0] : f32 from vector<1x1x1xf32>
      %75 = vector.broadcast %74 : f32 to vector<1x8x128xf32>
      %c0_45 = arith.constant 0 : index
      %c0_46 = arith.constant 0 : index
      %c0_47 = arith.constant 0 : index
      %76 = vector.load %arg7[%c0_45, %c0_46, %c0_47] : memref<1x8x128xf32, #tpu.memory_space<vmem>>, vector<1x8x128xf32>
      tpu.vector_store %arg7[%c0_45, %c0_46, %c0_47], %75 {strides = array<i32>} : memref<1x8x128xf32, #tpu.memory_space<vmem>>, vector<1x8x128xf32>,
    } else {
    }
    return
  }
  func.func @transform_0(%arg0: i32, %arg1: i32) -> (i32, i32) {
    %c0_i32 = arith.constant 0 : i32
    %c0_i32_0 = arith.constant 0 : i32
    return %arg0, %c0_i32 : i32, i32
  }
  func.func @transform_1(%arg0: i32, %arg1: i32) -> (i32, i32) {
    %c0_i32 = arith.constant 0 : i32
    %c0_i32_0 = arith.constant 0 : i32
    return %arg1, %c0_i32 : i32, i32
  }
  func.func @transform_2(%arg0: i32, %arg1: i32) -> (i32, i32) {
    %c1_i32 = arith.constant 1 : i32
    %c0_i32 = arith.constant 0 : i32
    %0 = arith.cmpi eq, %c1_i32, %c0_i32 : i32
    %c1_i32_0 = arith.constant 1 : i32
    %1 = arith.select %0, %c1_i32_0, %c1_i32 : i32
    %2 = arith.remsi %arg0, %1 : i32
    %c0_i32_1 = arith.constant 0 : i32
    %3 = arith.cmpi ne, %2, %c0_i32_1 : i32
    %c0_i32_2 = arith.constant 0 : i32
    %4 = arith.cmpi slt, %2, %c0_i32_2 : i32
    %c0_i32_3 = arith.constant 0 : i32
    %5 = arith.cmpi slt, %1, %c0_i32_3 : i32
    %6 = arith.xori %4, %5 : i1
    %7 = arith.andi %6, %3 : i1
    %8 = arith.addi %2, %1 : i32
    %9 = arith.select %7, %8, %2 : i32
    %c1_i32_4 = arith.constant 1 : i32
    %c0_i32_5 = arith.constant 0 : i32
    %10 = arith.cmpi eq, %c1_i32_4, %c0_i32_5 : i32
    %c1_i32_6 = arith.constant 1 : i32
    %11 = arith.select %10, %c1_i32_6, %c1_i32_4 : i32
    %12 = arith.remsi %arg1, %11 : i32
    %c0_i32_7 = arith.constant 0 : i32
    %13 = arith.cmpi ne, %12, %c0_i32_7 : i32
    %c0_i32_8 = arith.constant 0 : i32
    %14 = arith.cmpi slt, %12, %c0_i32_8 : i32
    %c0_i32_9 = arith.constant 0 : i32
    %15 = arith.cmpi slt, %11, %c0_i32_9 : i32
    %16 = arith.xori %14, %15 : i1
    %17 = arith.andi %16, %13 : i1
    %18 = arith.addi %12, %11 : i32
    %19 = arith.select %17, %18, %12 : i32
    %c0_i32_10 = arith.constant 0 : i32
    return %9, %19 : i32, i32
  }
  func.func @transform_3(%arg0: i32, %arg1: i32) -> (i32, i32) {
    %c1_i32 = arith.constant 1 : i32
    %c0_i32 = arith.constant 0 : i32
    %0 = arith.cmpi eq, %c1_i32, %c0_i32 : i32
    %c1_i32_0 = arith.constant 1 : i32
    %1 = arith.select %0, %c1_i32_0, %c1_i32 : i32
    %2 = arith.remsi %arg0, %1 : i32
    %c0_i32_1 = arith.constant 0 : i32
    %3 = arith.cmpi ne, %2, %c0_i32_1 : i32
    %c0_i32_2 = arith.constant 0 : i32
    %4 = arith.cmpi slt, %2, %c0_i32_2 : i32
    %c0_i32_3 = arith.constant 0 : i32
    %5 = arith.cmpi slt, %1, %c0_i32_3 : i32
    %6 = arith.xori %4, %5 : i1
    %7 = arith.andi %6, %3 : i1
    %8 = arith.addi %2, %1 : i32
    %9 = arith.select %7, %8, %2 : i32
    %c0_i32_4 = arith.constant 0 : i32
    %c0_i32_5 = arith.constant 0 : i32
    return %9, %c0_i32_4 : i32, i32
  }
  func.func @transform_4(%arg0: i32, %arg1: i32) -> (i32, i32) {
    %c1_i32 = arith.constant 1 : i32
    %c0_i32 = arith.constant 0 : i32
    %0 = arith.cmpi eq, %c1_i32, %c0_i32 : i32
    %c1_i32_0 = arith.constant 1 : i32
    %1 = arith.select %0, %c1_i32_0, %c1_i32 : i32
    %2 = arith.remsi %arg0, %1 : i32
    %c0_i32_1 = arith.constant 0 : i32
    %3 = arith.cmpi ne, %2, %c0_i32_1 : i32
    %c0_i32_2 = arith.constant 0 : i32
    %4 = arith.cmpi slt, %2, %c0_i32_2 : i32
    %c0_i32_3 = arith.constant 0 : i32
    %5 = arith.cmpi slt, %1, %c0_i32_3 : i32
    %6 = arith.xori %4, %5 : i1
    %7 = arith.andi %6, %3 : i1
    %8 = arith.addi %2, %1 : i32
    %9 = arith.select %7, %8, %2 : i32
    %c0_i32_4 = arith.constant 0 : i32
    %c0_i32_5 = arith.constant 0 : i32
    return %9, %c0_i32_4 : i32, i32
  }
  func.func @transform_5(%arg0: i32, %arg1: i32) -> (i32, i32, i32) {
    %c0_i32 = arith.constant 0 : i32
    %c0_i32_0 = arith.constant 0 : i32
    %c0_i32_1 = arith.constant 0 : i32
    return %arg0, %c0_i32, %c0_i32_0 : i32, i32, i32
  }
}

</mosaic_0001>

<bundles_post_ra>
// kernel: tpu_custom_call.1
= control target key start
LH: loop header
LB: loop body
LE: loop exit
PB: predicated region body
PF: predicated region fallthrough
CT: control target
= control target key end

     0   :  { %s902_s0 = inlined_call_operand.vmem [shape: bf16[16,32], index: 0, kind: input, shape index: {}]   ;;  %s903_s1 = inlined_call_operand.vmem [shape: bf16[16,32], index: 1, kind: input, shape index: {}]   ;;  %s904_s2 = inlined_call_operand.hbm [shape: f32[8,8], index: 2, kind: input, shape index: {}]   ;;  %s905_s3 = inlined_call_operand.vmem [shape: f32[8,1], index: 3, kind: input, shape index: {}]   ;;  %s906_s4 = inlined_call_operand.vmem [shape: f32[8,1], index: 4, kind: input, shape index: {}]   ;;  %s907_s5 = inlined_call_operand.hbm [shape: f32[2,8,128], index: 5, kind: output, shape index: {}]  }
   0x1   :  { %908 = sst [smem:[#allocation10_spill]] %s904_s2 }
   0x2   :  { %10 = vsyncpa [#allocation5], 0 }
   0x3   :  { %11 = vsyncpa [#allocation6], 0 }
   0x4   :  { %13 = vsyncpa [#allocation6 + $0x1], 0  ;;  %s753_s18 = smov 0   ;;  %s755_s19 = smov 0  }
   0x5   :  { %s757_s20 = smov 0   ;;  %s759_s21 = smov 0  }
   0x6   :  { %s761_s22 = smov 0   ;;  %s763_s23 = smov 0  }
   0x7   :  { %s765_s24 = smov 0   ;;  %s767_s25 = smov 0  }
   0x8 LB: > { %s481_s26 = sadd.s32 4294967295, %s719_s25   ;;  %s482_s27 = sadd.s32 4294967294, %s719_s25   ;;  %s719_s25 = sphi %s767_s25, %s19_s25   ;;  %s715_s24 = sphi %s765_s24, %s918_s24   ;;  %s711_s23 = sphi %s763_s23, %s917_s23   ;;  %s707_s22 = sphi %s761_s22, %s916_s22   ;;  %s703_s21 = sphi %s759_s21, %s915_s21   ;;  %s699_s20 = sphi %s757_s20, %s914_s20   ;;  %s695_s19 = sphi %s755_s19, %s913_s19   ;;  %s691_s18 = sphi %s753_s18, %s912_s18  }
   0x9   : > { %s28_s28 = sadd.s32 1, %s711_s23  ;;  %s31_s29 = sadd.s32 1, %s715_s24 }
   0xa   : > { %p29_p0 = scmp.ge.s32.totalorder %s28_s28, 2  ;;  %s153_s30 = sadd.s32 1, %s699_s20 }
   0xb   : > { %p163_p1 = scmp.ne.s32.totalorder %s699_s20, %s695_s19  ;;  %p164_p2 = scmp.eq.s32.totalorder %s481_s26, 3 }
   0xc   : > { %s920_s28 = smov (%p29_p0, %s28_s28), 0  ;;  %s922_s29 = smov (!%p29_p0, %s31_s29), %s715_s24 }
   0xd   : > { %p803_p3 = por %p164_p2, %p163_p1  ;;  %p169_p4 = scmp.ne.s32.totalorder %s695_s19, %s691_s18 }
   0xe   : > { %p33_p5 = scmp.ge.s32.totalorder %s922_s29, 2  ;;  %p170_p6 = scmp.eq.s32.totalorder %s482_s27, 3 }
   0xf   : > { %p483_p7 = scmp.ge.s32.totalorder %s719_s25, 1  ;;  %p177_p8 = scmp.lt.s32.totalorder %s719_s25, 5 }
  0x10   : > { %s924_s29 = smov (%p33_p5, %s922_s29), 0  ;;  %p813_p9 = por %p170_p6, %p169_p4 }
  0x11   : > { %p178_p10 = pnand %p483_p7, %p177_p8  ;;  %s150_s8 = ssub.s32 %s715_s24, %s924_s29 }
  0x12   : > { %p151_p11 = scmp.eq.s32.totalorder %s150_s8, 0  ;;  %p514_p13 = scmp.eq.s32.totalorder %s481_s26, 0 }
  0x13   : > { %p506_p12 = pneg %p178_p10  ;;  %s911_s2 = sld [smem:[#allocation10_spill]] }
  0x14   : > { %s823_s12 = scalar_select %p151_p11, %s699_s20, %s153_s30  }
  0x15   : > { %s721_s13 = smov [#allocation4]   ;;  %p507_p0 = pnand %p514_p13, %p506_p12 }
  0x16   : > { %s191_s14 = sshll.u32 %s721_s13, 4  ;;  %224 = sbr.rel (%p178_p10) target bundleno = 546 (0x222), region = 40  ;;  %s192_s14 = int_to_ptr.vmem [resolvable:$true] %s191_s14 }
  0x19   : > { %s189_s11 = sshll.u32 %s911_s2, 4  ;;  %s190_s11 = int_to_ptr.hbm [resolvable:$true] %s189_s11 }
  0x1a   : > { %509 = dma.hbm_to_vmem [thread:$0]  (!%p507_p0), %s190_s11, 128, %s192_s14, [#allocation5]  }
  0x1b   : > { %682 = dma.done.wait (%p514_p13), [#allocation5], 128  }
  0x1c   : > { %684 = vsyncadd (%p514_p13), [#allocation5], 4294967168  ;;  %s253_s15 = sand.u32 1, %s695_s19   ;;  %p256_p1 = scmp.lt.s32.totalorder %s707_s22, 1 }
  0x1d   : > { %s829_s16 = sshll.u32 %s253_s15, 3  ;;  %p260_p2 = scmp.lt.s32.totalorder %s703_s21, 1 }
  0x1e   : > { %s257_s17 = scalar_select %p256_p1, %s707_s22, 1 }
  0x1f   : > { %s261_s26 = scalar_select %p260_p2, %s703_s21, 1 }
  0x20   : > { %s489_s27 = sshll.u32 %s257_s17, 2  ;;  %s255_s2 = scalar_lea.vmem [#allocation7], %s829_s16 }
  0x21   : > { %s259_s9 = scalar_lea.vmem %s902_s0, %s489_s27  ;;  %s490_s10 = sshll.u32 %s261_s26, 2 }
  0x22   : > { %s263_s14 = scalar_lea.vmem %s903_s1, %s490_s10  ;;  %p491_p4 = scmp.ne.s32.totalorder %s703_s21, 0 }
  0x24   : > { %268 = sbr.rel (%p491_p4) target bundleno = 44 (0x2c), region = 48 }
  0x29   : > { %vm269_vm0 = vcmask 7168   ;;  %v722_v0 = vmov 0.0  }
  0x2a   : > { %270 = vst.msk [vmem:[#allocation2] sm:$0xff] %vm269_vm0, %v722_v0 }
  0x2b   : > { %271 = vst.msk [vmem:[#allocation3] sm:$0xff] %vm269_vm0, %v722_v0 }
  0x2c PF: > { %v273_v1 = vld [vmem:[%s263_s14] sm:$0xf]  ;;  %vm274_vm1 = vcmask 261120   ;;  %vm299_vm2 = vcmask 64512   ;;  %v297_v11 = vld [vmem:[#allocation4] sm:$0xff]  ;;  %p314_p5 = scmp.eq.s32.totalorder %s707_s22, %s703_s21  ;;  %vm326_vm4 = vcmask 7168  }
  0x2d   : > { %v279_v2 = vsel %vm274_vm1, %v273_v1, 0  ;;  %v272_v3 = vld [vmem:[%s259_s9] sm:$0xf]  ;;  %p493_p6 = scmp.ne.s32.totalorder %s703_s21, 1 }
  0x2e   : > { %288 = vmatpush.bf16.xpose.msra.mxu0 %v279_v2  ;;  %v306_v4 = vunpack.c.l.bf16 %v272_v3  ;;  %s315_s17 = scalar_select %p314_p5, 1, 0  ;;  %v320_v21 = vld [vmem:[%s906_s4] sm:$0xff] }
  0x30   : > { %v307_v5 = vmul.f32 %v306_v4, %v306_v4  ;;  %v316_v19 = vstv %s315_s17 }
  0x31   : > { %vm317_vm3 = vcmp.eq.s32.totalorder %v316_v19, 1  ;;  %v324_v28 = vld [vmem:[#allocation2] sm:$0xff] }
  0x32   : > { %v308_v6 = vsel %vm274_vm1, %v307_v5, 0.0  ;;  %v328_v24 = vld [vmem:[#allocation3] sm:$0xff] }
  0x33   : > { %309 = vadd.xlane.f32.xlu0 %v308_v6 }
  0x35   : > { %492 = vmatmul.msk.bf16.vlgmr.msra.gmra.mxu0 %vm274_vm1, %v272_v3 }
  0xa6   : > { %v310_v16 = vpop.xlane.xlu0 %309 }
  0xa7   : > { %v311_v17 = vmul.f32 14.285714, %v310_v16 }
  0xa9   : > { %v312_v18 = vmul.f32 1.442695, %v311_v17 }
  0xb2   : > { %v290_v7 = vpop.f32.mrf.mxu0 }
  0xb3   : > { %v294_v8 = vmul.f32 14.285714, %v290_v7 }
  0xb5   : > { %v295_v9 = vmul.f32 1.442695, %v294_v8 }
  0xb7   : > { %583 = vpow2.f32 %v295_v9 }
  0xb8   : > { %585 = vpow2.f32 %v312_v18 }
  0xba   : > { %v292_v10 = vpop.f32.mrf.mxu0 }
  0xbd   : > { %v584_v12 = vpop.eup %583 }
  0xbe   : > { %v303_v13 = vsel %vm299_vm2, %v584_v12, 0.0  ;;  %v298_v14 = vmul.f32 %v584_v12, %v297_v11  ;;  %v586_v20 = vpop.eup %585 }
  0xbf   : > { %304 = vadd.xlane.f32.xlu1 %v303_v13  ;;  %v321_v22 = vmul.f32 %v586_v20, %v320_v21  ;;  %v318_v23 = vsel %vm317_vm3, %v586_v20, 0.0 }
  0xc0   : > { %v300_v15 = vsel %vm299_vm2, %v298_v14, 0.0 }
  0xc1   : > { %301 = vadd.xlane.f32.xlu0 %v300_v15  ;;  %v322_v26 = vsel %vm317_vm3, %v321_v22, 0.0 }
 0x132   : > { %v305_v25 = vpop.xlane.xlu1 %304 }
 0x133   : > { %v319_v27 = vsub.f32 %v305_v25, %v318_v23 }
 0x134   : > { %v302_v29 = vpop.xlane.xlu0 %301 }
 0x135   : > { %v329_v30 = vadd.f32 %v328_v24, %v319_v27  ;;  %v323_v31 = vsub.f32 %v302_v29, %v322_v26  ;;  %334 = sbr.rel (%p493_p6) target bundleno = 531 (0x213), region = 52 }
 0x137   : > { %330 = vst.msk [vmem:[#allocation3] sm:$0xff] %vm326_vm4, %v329_v30  ;;  %v325_v32 = vadd.f32 %v324_v28, %v323_v31 }
 0x139   : > { %327 = vst.msk [vmem:[#allocation2] sm:$0xff] %vm326_vm4, %v325_v32 }
 0x13a   : > { %v356_v48 = vld [vmem:[%s905_s3] sm:$0xff] }
 0x13b   : > { %vm357_vm9 = vcmp.gt.f32.partialorder %v356_v48, 0.0 }
 0x13e   : > { %v336_v33 = vld [vmem:[#allocation3] sm:$0xff] }
 0x13f   : > { %v338_v34 = vadd.f32 1e-08, %v336_v33 }
 0x140   : > { %v335_v40 = vld [vmem:[#allocation2] sm:$0xff] }
 0x141   : > { %587 = vrcp.f32 %v338_v34  ;;  %v350_v37 = vand.u32 2147483648, %v338_v34  ;;  %vm344_vm5 = vweird.f32 %v338_v34  ;;  %v348_v39 = vand.u32 2147483647, %v338_v34 }
 0x142   : > { %v337_v43 = vadd.f32 1e-08, %v335_v40 }
 0x143   : > { %v351_v42 = vor.u32 1.1754944e-38, %v350_v37  ;;  %vm349_vm8 = vcmp.eq.f32.partialorder %v348_v39, 8.507059e+37 }
 0x147   : > { %v588_v35 = vpop.eup %587 }
 0x148   : > { %v340_v36 = vmul.f32 %v588_v35, %v338_v34  ;;  %vm345_vm6 = vweird.f32 %v588_v35 }
 0x149   : > { %vm346_vm7 = vmor %vm344_vm5, %vm345_vm6 }
 0x14a   : > { %v341_v38 = vsub.f32 1.0, %v340_v36 }
 0x14c   : > { %v342_v41 = vmul.f32 %v588_v35, %v341_v38 }
 0x14e   : > { %v343_v44 = vadd.f32 %v588_v35, %v342_v41 }
 0x150   : > { %v347_v45 = vsel %vm346_vm7, %v588_v35, %v343_v44 }
 0x151   : > { %v352_v46 = vsel %vm349_vm8, %v351_v42, %v347_v45 }
 0x152   : > { %v353_v47 = vmul.f32 %v352_v46, %v337_v43 }
 0x154   : > { %589 = vlog2.f32 %v353_v47 }
 0x15a   : > { %v590_v49 = vpop.eup %589 }
 0x15b   : > { %v355_v50 = vmul.f32 0.6931472, %v590_v49 }
 0x15d   : > { %v358_v51 = vsel %vm357_vm9, %v355_v50, 0.0 }
 0x15e   : > { %v359_v52 = vsel %vm326_vm4, %v358_v51, 0.0 }
 0x15f   : > { %360 = vadd.xlane.f32.xlu0 %v359_v52 }
 0x1d2   : > { %v361_v53 = vpop.xlane.xlu0 %360 }
 0x1d3   : > { %v362_v54 = vrot.slane %v361_v53, 4 }
 0x1d5   : > { %v363_v55 = vadd.f32 %v362_v54, %v361_v53 }
 0x1d7   : > { %v364_v56 = vrot.slane %v363_v55, 2 }
 0x1d9   : > { %v365_v57 = vadd.f32 %v364_v56, %v363_v55 }
 0x1db   : > { %v366_v58 = vrot.slane %v365_v57, 1 }
 0x1dd   : > { %v367_v59 = vadd.f32 %v366_v58, %v365_v57 }
 0x1df   : > { %498 = vpush %v367_v59 }
 0x210   : > { %s499_s8 = spop %498 }
 0x211   : > { %v369_v60 = vstv %s499_s8 }
 0x212   : > { %370 = vst [vmem:[%s255_s2] sm:$0xff] %v369_v60 }
 0x213 PF: > { %s495_s9 = sshll.u32 %s707_s22, 3  ;;  %s384_s14 = sshll.u32 %s255_s2, 4  ;;  %s385_s14 = int_to_ptr.vmem [resolvable:$true] %s384_s14 }
 0x214   : > { %s382_s13 = scalar_lea.hbm %s907_s5, %s495_s9  ;;  %s372_s26 = scalar_lea.sflag [#allocation6], %s253_s15 }
 0x215   : > { %s386_s17 = sshll.u32 %s382_s13, 4  ;;  %s641_s8 = scalar_lea.hbm %s907_s5, 16  ;;  %s387_s17 = int_to_ptr.hbm [resolvable:$true] %s386_s17 }
 0x216   : > { %s635_s27 = sshra.s32 %s387_s17, 4  ;;  %s636_s27 = int_to_ptr.hbm [resolvable:$true] %s635_s27 }
 0x217   : > { %s637_s21 = scalar_lea.hbm %s636_s27, 8  ;;  %p642_p11 = scmp.lt.s32.totalorder %s636_s27, %s907_s5 }
 0x218   : > { %p638_p7 = scmp.ne.s32.totalorder %s636_s27, %s637_s21  ;;  %p643_p12 = scmp.lt.s32.totalorder %s641_s8, %s637_s21 }
 0x21a   : > { %p639_p8 = pnand %p638_p7, %p803_p3  ;;  %p644_p13 = por %p643_p12, %p642_p11 }
 0x21c   : > { %p640_p10 = pneg %p639_p8 }
 0x21e   : > { %p645_p0 = pnand %p644_p13, %p640_p10 }
 0x220   : > { %648 = shalt.err (!%p645_p0)
}
 0x221   : > { %504 = dma.vmem_to_hbm [thread:$0]  (%p803_p3), %s385_s14, 128, %s387_s17, %s372_s26  }
 0x222 PF: > { %p516_p1 = scmp.ge.s32.totalorder %s719_s25, 2  ;;  %s398_s2 = sand.u32 1, %s691_s18  }
 0x223   : > { %s399_s15 = scalar_lea.sflag [#allocation6], %s398_s2 }
 0x224   : > { %p511_p2 = pnand %p516_p1, %p813_p9 }
 0x226   : > { %p512_p4 = pneg %p511_p2 }
 0x228   : > { %686 = dma.done.wait (%p512_p4), %s399_s15, 128  }
 0x229   : > { %688 = vsyncadd (%p512_p4), %s399_s15, 4294967168  ;;  %s19_s25 = sadd.s32 1, %s719_s25   ;;  %s912_s18 = smov %s695_s19 }
 0x22a   : > { %p16_p5 = scmp.ge.s32.totalorder %s19_s25, 6   ;;  %s913_s19 = smov %s699_s20 }
 0x22b   : > { %s914_s20 = smov %s823_s12  ;;  %s915_s21 = smov %s711_s23 }
 0x22c   : > { %s916_s22 = smov %s715_s24  ;;  %s917_s23 = smov %s920_s28 }
 0x22d   : > { %s918_s24 = smov %s924_s29  ;;  %18 = sbr.rel (!%p16_p5) target bundleno = 8 (0x8), region = 91 }
 0x232   :  { %405 = vsyncpa [#allocation5], 1 }
 0x233   :  { %407 = vsyncpa [#allocation5 + $0x1], 1 }
 0x234   :  { %408 = vsyncpa [#allocation6], 1 }
 0x235   :  { %410 = vsyncpa [#allocation6 + $0x1], 1 }

</bundles_post_ra>
